<compile_context>
chip_gen: v6e
topology: v6e:2x2x1
jax: 0.10.0
libtpu: 0.0.40
codegen_flags: <defaults>
</compile_context>

<pallas_src>
import functools

import jax
import jax.numpy as jnp
from jax.experimental import pallas as pl
from jax.experimental.pallas import tpu as pltpu

IN_FEATURES = 20
HIDDEN = 256
OUT_FEATURES = 10
DEFAULT_TB = 2048     # batch tile (rows per grid step); multiple of 16


def _round_up(a, m):
    return ((a + m - 1) // m) * m


def mlp_kernel(x_ref, w1_ref, b1_ref, w2_ref, b2_ref, o_ref, h_ref):
    # hidden = relu(x @ W1 + b1): bf16 MXU operands, f32 accumulation.
    x = x_ref[...].astype(jnp.bfloat16)
    h = jnp.dot(x, w1_ref[...], preferred_element_type=jnp.float32)
    # Stage the hidden activation in a bf16 VMEM scratch (avoids an f32
    # spill/reload of the (tb, 256) intermediate between the two matmuls).
    h_ref[...] = jnp.maximum(h + b1_ref[...], 0.0).astype(jnp.bfloat16)
    # out = h @ W2 + b2: bias add in f32, store only the 10 real columns.
    out = jnp.dot(h_ref[...], w2_ref[...], preferred_element_type=jnp.float32)
    o_ref[...] = (out + b2_ref[...]).astype(o_ref.dtype)


def pack_params(w1, b1, w2, b2):
    """One-time packing into kernel layout/dtypes (hoisted out of the
    per-call path): W in bf16 (in, out), biases as (1, out) f32."""
    return (w1.astype(jnp.bfloat16),
            b1.reshape(1, HIDDEN).astype(jnp.float32),
            w2.astype(jnp.bfloat16),
            b2.reshape(1, OUT_FEATURES).astype(jnp.float32))


@functools.partial(jax.jit, static_argnames=("block_b",))
def mlp_forward(x, w1_b, b1_2d, w2_b, b2_2d, *, block_b=DEFAULT_TB):
    """x: (B, 20) f32; packed params from pack_params(). Returns (B, 10) f32."""
    B = x.shape[0]

    # Batch tile: multiple of 16 (bf16 sublane packing); for large B prefer
    # >=4 grid steps so v7x's two TensorCores both get work.
    tb = min(block_b, max(16, _round_up((B + 3) // 4, 16)))
    grid = (pl.cdiv(B, tb),)  # partial last block: tail-row stores are masked

    return pl.pallas_call(
        mlp_kernel,
        out_shape=jax.ShapeDtypeStruct((B, OUT_FEATURES), jnp.float32),
        grid_spec=pltpu.PrefetchScalarGridSpec(
            num_scalar_prefetch=0,
            grid=grid,
            in_specs=[
                # x streams tile-by-tile (software-pipelined / double-buffered).
                pl.BlockSpec((tb, IN_FEATURES), lambda i: (i, 0)),
                # Weights & biases: constant index_map -> stay VMEM-resident.
                pl.BlockSpec((IN_FEATURES, HIDDEN), lambda i: (0, 0)),
                pl.BlockSpec((1, HIDDEN), lambda i: (0, 0)),
                pl.BlockSpec((HIDDEN, OUT_FEATURES), lambda i: (0, 0)),
                pl.BlockSpec((1, OUT_FEATURES), lambda i: (0, 0)),
            ],
            out_specs=pl.BlockSpec((tb, OUT_FEATURES), lambda i: (i, 0)),
            scratch_shapes=[pltpu.VMEM((tb, HIDDEN), jnp.bfloat16)],
        ),
        compiler_params=pltpu.CompilerParams(
            # Independent batch tiles -> shard across TCs on v7x megacore.
            dimension_semantics=("parallel",),
            # Above v5e's 16 MiB scoped default; headroom for block_b up to 4096.
            vmem_limit_bytes=32 * 1024 * 1024,
        ),
    )(x, w1_b, b1_2d, w2_b, b2_2d)


def init_params(key):
    """Deterministic init mimicking nn.Linear default (uniform(-1/sqrt(fan_in)))."""
    k1, k2, k3, k4 = jax.random.split(key, 4)
    bound1 = 1.0 / jnp.sqrt(20.0)
    bound2 = 1.0 / jnp.sqrt(256.0)
    # Stored already transposed: (in_features, out_features).
    w1 = jax.random.uniform(k1, (IN_FEATURES, HIDDEN), jnp.float32, -bound1, bound1)
    b1 = jax.random.uniform(k2, (HIDDEN,), jnp.float32, -bound1, bound1)
    w2 = jax.random.uniform(k3, (HIDDEN, OUT_FEATURES), jnp.float32, -bound2, bound2)
    b2 = jax.random.uniform(k4, (OUT_FEATURES,), jnp.float32, -bound2, bound2)
    return w1, b1, w2, b2


def _reference(x, w1, b1, w2, b2):
    # Plain-JAX reference with the same bf16 operand quantization (f32
    # accumulation) as the kernel.  NOTE: bf16 operands intentionally differ
    # from the pure-f32 PyTorch MLP; tolerance vs. true f32 is ~1e-2.
    xb = x.astype(jnp.bfloat16).astype(jnp.float32)
    w1b = w1.astype(jnp.bfloat16).astype(jnp.float32)
    w2b = w2.astype(jnp.bfloat16).astype(jnp.float32)
    h = jnp.maximum(xb @ w1b + b1, 0.0)
    return h.astype(jnp.bfloat16).astype(jnp.float32) @ w2b + b2


if __name__ == "__main__":
    key = jax.random.PRNGKey(0)
    kx, kx2, kp = jax.random.split(key, 3)

    w1, b1, w2, b2 = init_params(kp)
    packed = pack_params(w1, b1, w2, b2)

    # Tiny test batch (exercises a single partial block).
    batch = 2
    x = jax.random.normal(kx, (batch, IN_FEATURES), jnp.float32)
    out = jax.block_until_ready(mlp_forward(x, *packed))
    ref = _reference(x, w1, b1, w2, b2)
    assert out.shape == (batch, OUT_FEATURES)
    assert jnp.allclose(out, ref, atol=1e-3, rtol=1e-3), (
        f"max abs err {jnp.max(jnp.abs(out - ref))}")

    # Small non-multiple batch: exercises multiple grid steps + masked tail.
    batch2 = 50
    x2 = jax.random.normal(kx2, (batch2, IN_FEATURES), jnp.float32)
    out2 = jax.block_until_ready(mlp_forward(x2, *packed))
    ref2 = _reference(x2, w1, b1, w2, b2)
    assert out2.shape == (batch2, OUT_FEATURES)
    assert jnp.allclose(out2, ref2, atol=1e-3, rtol=1e-3), (
        f"max abs err {jnp.max(jnp.abs(out2 - ref2))}")

    print("KERNEL_OK")
</pallas_src>

<mosaic_0001>
module attributes {stable_mosaic.version = 11 : i64} {
  func.func @mlp_kernel(%arg0: i32, %arg1: memref<16x20xf32, #tpu.memory_space<vmem>>, %arg2: memref<20x256xbf16, #tpu.memory_space<vmem>>, %arg3: memref<1x256xf32, #tpu.memory_space<vmem>>, %arg4: memref<256x10xbf16, #tpu.memory_space<vmem>>, %arg5: memref<1x10xf32, #tpu.memory_space<vmem>>, %arg6: memref<16x10xf32, #tpu.memory_space<vmem>>, %arg7: memref<16x256xbf16, #tpu.memory_space<vmem>>) attributes {dimension_semantics = [#tpu.dimension_semantics<parallel>], iteration_bounds = array<i64: 1>, scalar_prefetch = 0 : i64, scratch_operands = 1 : i64, tpu.core_type = #tpu.core_type<tc>, window_params = [{transform_indices = @transform_0, window_bounds = array<i64: 16, 20>}, {pipeline_mode = #tpu.pipeline_mode<synchronous>, transform_indices = @transform_1, window_bounds = array<i64: 20, 256>}, {pipeline_mode = #tpu.pipeline_mode<synchronous>, transform_indices = @transform_2, window_bounds = array<i64: 1, 256>}, {pipeline_mode = #tpu.pipeline_mode<synchronous>, transform_indices = @transform_3, window_bounds = array<i64: 256, 10>}, {pipeline_mode = #tpu.pipeline_mode<synchronous>, transform_indices = @transform_4, window_bounds = array<i64: 1, 10>}, {transform_indices = @transform_5, window_bounds = array<i64: 16, 10>}]} {
    %c0 = arith.constant 0 : index
    %c0_0 = arith.constant 0 : index
    %0 = vector.load %arg1[%c0, %c0_0] : memref<16x20xf32, #tpu.memory_space<vmem>>, vector<16x20xf32>
    %1 = arith.truncf %0 : vector<16x20xf32> to vector<16x20xbf16>
    %c0_1 = arith.constant 0 : index
    %c0_2 = arith.constant 0 : index
    %2 = vector.load %arg2[%c0_1, %c0_2] : memref<20x256xbf16, #tpu.memory_space<vmem>>, vector<20x256xbf16>
    %cst = arith.constant dense<0.000000e+00> : vector<16x256xf32>
    %3 = tpu.matmul %1, %2, %cst {dimension_numbers = #tpu.dot_dimension_numbers<[1], [0], [0], [1], [0, 0, 1, 1], [], []>} : vector<16x20xbf16>, vector<20x256xbf16>, vector<16x256xf32> -> vector<16x256xf32>
    %c0_3 = arith.constant 0 : index
    %c0_4 = arith.constant 0 : index
    %4 = vector.load %arg3[%c0_3, %c0_4] : memref<1x256xf32, #tpu.memory_space<vmem>>, vector<1x256xf32>
    %5 = vector.broadcast %4 : vector<1x256xf32> to vector<16x256xf32>
    %6 = arith.addf %3, %5 : vector<16x256xf32>
    %cst_5 = arith.constant 0.000000e+00 : f32
    %7 = vector.broadcast %cst_5 : f32 to vector<16x256xf32>
    %8 = arith.maximumf %6, %7 : vector<16x256xf32>
    %9 = arith.truncf %8 : vector<16x256xf32> to vector<16x256xbf16>
    %c0_6 = arith.constant 0 : index
    %c0_7 = arith.constant 0 : index
    %10 = vector.load %arg7[%c0_6, %c0_7] : memref<16x256xbf16, #tpu.memory_space<vmem>>, vector<16x256xbf16>
    tpu.vector_store %arg7[%c0_6, %c0_7], %9 {strides = array<i32>} : memref<16x256xbf16, #tpu.memory_space<vmem>>, vector<16x256xbf16>,
    %c0_8 = arith.constant 0 : index
    %c0_9 = arith.constant 0 : index
    %11 = vector.load %arg7[%c0_8, %c0_9] : memref<16x256xbf16, #tpu.memory_space<vmem>>, vector<16x256xbf16>
    %c0_10 = arith.constant 0 : index
    %c0_11 = arith.constant 0 : index
    %12 = vector.load %arg4[%c0_10, %c0_11] : memref<256x10xbf16, #tpu.memory_space<vmem>>, vector<256x10xbf16>
    %cst_12 = arith.constant dense<0.000000e+00> : vector<16x10xf32>
    %13 = tpu.matmul %11, %12, %cst_12 {dimension_numbers = #tpu.dot_dimension_numbers<[1], [0], [0], [1], [0, 0, 1, 1], [], []>} : vector<16x256xbf16>, vector<256x10xbf16>, vector<16x10xf32> -> vector<16x10xf32>
    %c0_13 = arith.constant 0 : index
    %c0_14 = arith.constant 0 : index
    %14 = vector.load %arg5[%c0_13, %c0_14] : memref<1x10xf32, #tpu.memory_space<vmem>>, vector<1x10xf32>
    %15 = vector.broadcast %14 : vector<1x10xf32> to vector<16x10xf32>
    %16 = arith.addf %13, %15 : vector<16x10xf32>
    %c0_15 = arith.constant 0 : index
    %c0_16 = arith.constant 0 : index
    %17 = vector.load %arg6[%c0_15, %c0_16] : memref<16x10xf32, #tpu.memory_space<vmem>>, vector<16x10xf32>
    tpu.vector_store %arg6[%c0_15, %c0_16], %16 {strides = array<i32>} : memref<16x10xf32, #tpu.memory_space<vmem>>, vector<16x10xf32>,
    return
  }
  func.func @transform_0(%arg0: i32) -> (i32, i32) {
    %c0_i32 = arith.constant 0 : i32
    %c0_i32_0 = arith.constant 0 : i32
    return %arg0, %c0_i32 : i32, i32
  }
  func.func @transform_1(%arg0: i32) -> (i32, i32) {
    %c0_i32 = arith.constant 0 : i32
    %c0_i32_0 = arith.constant 0 : i32
    %c0_i32_1 = arith.constant 0 : i32
    return %c0_i32, %c0_i32_0 : i32, i32
  }
  func.func @transform_2(%arg0: i32) -> (i32, i32) {
    %c0_i32 = arith.constant 0 : i32
    %c0_i32_0 = arith.constant 0 : i32
    %c0_i32_1 = arith.constant 0 : i32
    return %c0_i32, %c0_i32_0 : i32, i32
  }
  func.func @transform_3(%arg0: i32) -> (i32, i32) {
    %c0_i32 = arith.constant 0 : i32
    %c0_i32_0 = arith.constant 0 : i32
    %c0_i32_1 = arith.constant 0 : i32
    return %c0_i32, %c0_i32_0 : i32, i32
  }
  func.func @transform_4(%arg0: i32) -> (i32, i32) {
    %c0_i32 = arith.constant 0 : i32
    %c0_i32_0 = arith.constant 0 : i32
    %c0_i32_1 = arith.constant 0 : i32
    return %c0_i32, %c0_i32_0 : i32, i32
  }
  func.func @transform_5(%arg0: i32) -> (i32, i32) {
    %c0_i32 = arith.constant 0 : i32
    %c0_i32_0 = arith.constant 0 : i32
    return %arg0, %c0_i32 : i32, i32
  }
}

</mosaic_0001>

<bundles_post_ra>
// kernel: mlp_forward.1
= control target key start
LH: loop header
LB: loop body
LE: loop exit
PB: predicated region body
PF: predicated region fallthrough
CT: control target
= control target key end

     0   :  { %10 = vsyncpa [#allocation4], 0  ;;  %vm59_vm0 = vcmask 1041408   ;;  %v434_v5 = vmov 0   ;;  %vm55_vm1 = vcmask 162816   ;;  %v30_v26 = vlaneseq  ;;  %s540_s0 = inlined_call_operand.vmem [shape: f32[2,20], index: 0, kind: input, shape index: {}]   ;;  %s541_s1 = inlined_call_operand.vmem [shape: bf16[20,256], index: 1, kind: input, shape index: {}]   ;;  %s542_s2 = inlined_call_operand.vmem [shape: f32[1,256], index: 2, kind: input, shape index: {}]   ;;  %s543_s3 = inlined_call_operand.vmem [shape: bf16[256,10], index: 3, kind: input, shape index: {}]   ;;  %s544_s4 = inlined_call_operand.vmem [shape: f32[1,10], index: 4, kind: input, shape index: {}]   ;;  %s545_s5 = inlined_call_operand.hbm [shape: f32[2,10], index: 5, kind: output, shape index: {}]  }
   0x1   :  { %v27_v0 = vld [vmem:[%s541_s1 + $0x10] sm:$0x33]  ;;  %v393_v3 = vld [vmem:[%s541_s1 + $0x4] ss:$8 sps:$4 sm:$0xff]   ;;  %v395_v4 = vld [vmem:[%s541_s1] ss:$8 sps:$4 sm:$0xff]   ;;  %98 = vmatprep.mubr.bf16.mxu0 %v434_v5 }
   0x2   :  { %v337_v1 = vcombine.high %v27_v0, %v27_v0  ;;  %v336_v2 = vcombine.low %v27_v0, %v27_v0  ;;  %v22_v6 = vld [vmem:[%s540_s0] sm:$0xff]  ;;  %v23_v7 = vld [vmem:[%s540_s0 + $0x8] sm:$0xff]  ;;  %v396_v9 = vld [vmem:[%s543_s3 + $0x78] sm:$0xff]   ;;  %v31_v27 = vshrl.u32 %v30_v26, 7  ;;  %vm315_vm2 = vcmask 80896  }
   0x3   :  { %v397_v10 = vld [vmem:[%s543_s3 + $0x38] sm:$0xff]   ;;  %365 = vmatprep.subr.bf16.mxu1 %v396_v9  ;;  %v398_v11 = vld [vmem:[%s543_s3 + $0x70] sm:$0xff]   ;;  %v24_v13 = vpack.c.bf16 %v23_v7, %v22_v6  ;;  %v400_v14 = vld [vmem:[%s543_s3 + $0x68] sm:$0xff]  }
   0x4   :  { %338 = vmatprep.subr.msk.bf16.mxu0 %vm59_vm0, %v337_v1  ;;  %v61_v8 = vsel %vm59_vm0, %v336_v2, 0  ;;  %366 = vmatpush3.bf16.msra.mxu1 %v397_v10  ;;  %v399_v12 = vld [vmem:[%s543_s3 + $0x30] sm:$0xff]   ;;  %v401_v15 = vld [vmem:[%s543_s3 + $0x28] sm:$0xff]   ;;  %v402_v16 = vld [vmem:[%s543_s3 + $0x60] sm:$0xff]   ;;  %v36_v28 = vsub.s32 1, %v31_v27  ;;  %v32_v29 = vsub.s32 0, %v31_v27 }
   0x5   :  { %79 = vmatpush1.bf16.msra.mxu0 %v61_v8  ;;  %367 = vmatprep.subr.bf16.mxu1 %v398_v11  ;;  %v403_v17 = vld [vmem:[%s543_s3 + $0x20] sm:$0xff]   ;;  %v404_v18 = vld [vmem:[%s543_s3 + $0x58] sm:$0xff]   ;;  %v406_v20 = vld [vmem:[%s543_s3 + $0x50] sm:$0xff]  }
   0x6   :  { %80 = vmatprep.subr.bf16.mxu0 %v393_v3  ;;  %v405_v19 = vld [vmem:[%s543_s3 + $0x18] sm:$0xff]   ;;  %v407_v21 = vld [vmem:[%s543_s3 + $0x10] sm:$0xff]   ;;  %v408_v22 = vld [vmem:[%s543_s3 + $0x48] sm:$0xff]  }
   0x7   :  { %v409_v23 = vld [vmem:[%s543_s3 + $0x8] sm:$0xff]   ;;  %v410_v24 = vld [vmem:[%s543_s3 + $0x40] sm:$0xff]  }
   0x8   :  { %368 = vmatpush3.bf16.msra.mxu1 %v399_v12  ;;  %v411_v25 = vld [vmem:[%s543_s3] sm:$0xff]  }
   0x9   :  { %81 = vmatpush1.bf16.msra.mxu0 %v395_v4  ;;  %369 = vmatprep.subr.bf16.mxu1 %v400_v14  ;;  %v28_v30 = vld [vmem:[%s542_s2] sm:$0x3] }
   0xa   :  { %v37_v32 = vrot.slane %v28_v30, %v36_v28  ;;  %v33_v33 = vrot.slane %v28_v30, %v32_v29  ;;  %v342_v48 = vld [vmem:[%s544_s4] ss:$0 sm:$0xff] }
   0xc   :  { %339 = vmatmul.mubr.msk.bf16.vlgmr.msra.gmra.mxu0 %vm55_vm1, %v24_v13  ;;  %370 = vmatpush3.bf16.msra.mxu1 %v401_v15 }
   0xd   :  { %371 = vmatprep.subr.bf16.mxu1 %v402_v16 }
  0x10   :  { %372 = vmatpush3.bf16.msra.mxu1 %v403_v17 }
  0x11   :  { %373 = vmatprep.subr.bf16.mxu1 %v404_v18 }
  0x14   :  { %374 = vmatpush3.bf16.msra.mxu1 %v405_v19 }
  0x15   :  { %375 = vmatprep.subr.bf16.mxu1 %v406_v20 }
  0x18   :  { %376 = vmatpush3.bf16.msra.mxu1 %v407_v21 }
  0x19   :  { %377 = vmatprep.subr.bf16.mxu1 %v408_v22 }
  0x1c   :  { %378 = vmatpush3.bf16.msra.mxu1 %v409_v23 }
  0x1d   :  { %379 = vmatprep.subr.bf16.mxu1 %v410_v24 }
  0x20   :  { %380 = vmatpush3.bf16.msra.mxu1 %v411_v25 }
  0xcc   :  { %v100_v31 = vpop.f32.mrf.mxu0 }
  0xcd   :  { %v101_v38 = vadd.f32 %v100_v31, %v33_v33 }
  0xce   :  { %v102_v34 = vpop.f32.mrf.mxu0 }
  0xcf   :  { %v103_v36 = vadd.f32 %v102_v34, %v37_v32  ;;  %v109_v44 = vmax.f32 %v101_v38, 0.0 }
  0xd0   :  { %v104_v35 = vpop.f32.mrf.mxu0 }
  0xd1   :  { %v105_v37 = vadd.f32 %v104_v35, %v33_v33  ;;  %v110_v42 = vmax.f32 %v103_v36, 0.0 }
  0xd2   :  { %v106_v39 = vpop.f32.mrf.mxu0 }
  0xd3   :  { %v107_v40 = vadd.f32 %v106_v39, %v37_v32  ;;  %v111_v41 = vmax.f32 %v105_v37, 0.0 }
  0xd5   :  { %v112_v43 = vmax.f32 %v107_v40, 0.0  ;;  %v363_v46 = vpack.c.bf16 %v111_v41, %v109_v44 }
  0xd7   :  { %v364_v45 = vpack.c.bf16 %v112_v43, %v110_v42 }
  0xd9   :  { %306 = vmatprep.mubr.bf16.mxu1 %v364_v45 }
  0xda   :  { %307 = vmatmul.mubr.bf16.vlgmr.msra.gmra.mxu1 %v363_v46 }
 0x19a   :  { %v381_v47 = vpop.f32.mrf.mxu1 }
 0x19c   :  { %v382_v49 = vpop.f32.mrf.mxu1 }
 0x19d   :  { %v383_v50 = vadd.f32 %v382_v49, %v381_v47 }
 0x19e   :  { %v384_v51 = vpop.f32.mrf.mxu1 }
 0x19f   :  { %v309_v52 = vadd.f32 %v383_v50, %v342_v48 }
 0x1a0   :  { %v385_v53 = vpop.f32.mrf.mxu1 }
 0x1a1   :  { %316 = vst.msk [vmem:[#allocation3] sm:$0xff] %vm315_vm2, %v309_v52  ;;  %v386_v54 = vadd.f32 %v385_v53, %v384_v51 }
 0x1a3   :  { %v312_v55 = vadd.f32 %v386_v54, %v342_v48 }
 0x1a5   :  { %317 = vst.msk [vmem:[#allocation3 + $0x8] sm:$0xff] %vm315_vm2, %v312_v55 }
 0x1a6   :  { %322 = vsyncadd [#allocation4], 224  ;;  %s435_s0 = smov [#allocation3]  }
 0x1a7   :  { %s323_s9 = sshll.u32 %s435_s0, 4  ;;  %s324_s9 = int_to_ptr.vmem [resolvable:$true] %s323_s9 }
 0x1a8   :  { %s412_s10 = scalar_lea.vmem %s324_s9, 32  ;;  %s416_s11 = scalar_lea.vmem %s324_s9, 256 }
 0x1a9   :  { %p413_p0 = scmp.ne.s32.totalorder %s324_s9, %s412_s10  ;;  %p417_p1 = scmp.lt.s32.totalorder %s324_s9, %s324_s9 }
 0x1aa   :  { %p418_p2 = scmp.lt.s32.totalorder %s416_s11, %s412_s10 }
 0x1ac   :  { %p419_p3 = por %p418_p2, %p417_p1 }
 0x1ae   :  { %p420_p4 = pnand %p419_p3, %p413_p0 }
 0x1b0   :  { %423 = shalt.err (!%p420_p4)
}
 0x1b1   :  { %s436_s4 = smov 32   ;;  %s437_s12 = smov 2  }
 0x1b2   :  { %329 = dma.vmem_to_hbm [thread:$0]  %s324_s9, 32, %s545_s5, [#allocation4], %s436_s4, %s436_s4, %s437_s12  }
 0x1b3   :  { %432 = dma.done.wait [#allocation4], 256  }
 0x1b4   :  { %433 = vsyncadd [#allocation4], 4294967040 }
 0x1b5   :  { %333 = vsyncpa [#allocation4], 1 }

</bundles_post_ra>
